<compile_context>
chip_gen: v7x
topology: tpu7x:2x2x1
jax: 0.10.0
libtpu: 0.0.40
codegen_flags: <defaults>
</compile_context>

<pallas_src>
import jax
import jax.numpy as jnp
from jax.experimental import pallas as pl
from jax.experimental.pallas import tpu as pltpu


def _round_up(n, m):
    return ((n + m - 1) // m) * m


def _sep_mlp_kernel(x_ref, w1_ref, b1_ref, w2_ref, b2_ref, o_ref):
    """One feature head per grid step: relu(x @ W1 + b1) @ W2 + b2."""
    x = x_ref[...]                                        # [Bp, D]
    h = jnp.dot(x, w1_ref[...],
                preferred_element_type=jnp.float32)       # [Bp, H]  (MXU)
    h = jnp.maximum(h + b1_ref[...], 0.0)                 # bias + ReLU, f32 VPU
    o = jnp.dot(h, w2_ref[...],
                preferred_element_type=jnp.float32)       # [Bp, Cp] (MXU)
    o_ref[...] = (o + b2_ref[...]).astype(o_ref.dtype)    # lane-dense store


def init_sep_mlp_params(key, dim, categories):
    """Per-head params mirroring nn.Linear default init (uniform +/- 1/sqrt(fan_in))."""
    params = []
    hidden = 5 * dim
    for c in categories:
        key, k1, k2, k3, k4 = jax.random.split(key, 5)
        bound1 = 1.0 / jnp.sqrt(dim)
        bound2 = 1.0 / jnp.sqrt(hidden)
        w1 = jax.random.uniform(k1, (dim, hidden), jnp.float32, -bound1, bound1)
        b1 = jax.random.uniform(k2, (1, hidden), jnp.float32, -bound1, bound1)
        w2 = jax.random.uniform(k3, (hidden, c), jnp.float32, -bound2, bound2)
        b2 = jax.random.uniform(k4, (1, c), jnp.float32, -bound2, bound2)
        params.append((w1, b1, w2, b2))
    return params


def pack_sep_mlp_params(params):
    """Stack per-head params along a feature axis; zero-pad C_i up to C_pad=128.

    Zero-padded W2/b2 columns produce zero logits in the padded lanes, which the
    wrapper slices off, so valid logits are unaffected.
    """
    c_pad = _round_up(max(p[2].shape[1] for p in params), 128)
    w1s = jnp.stack([p[0] for p in params])                              # [F, D, H]
    b1s = jnp.stack([p[1] for p in params])                              # [F, 1, H]
    w2s = jnp.stack([jnp.pad(p[2], ((0, 0), (0, c_pad - p[2].shape[1])))
                     for p in params])                                   # [F, H, Cp]
    b2s = jnp.stack([jnp.pad(p[3], ((0, 0), (0, c_pad - p[3].shape[1])))
                     for p in params])                                   # [F, 1, Cp]
    return w1s, b1s, w2s, b2s


def sep_mlp_forward(x, packed, categories):
    """x: [B, F, D]; returns list of per-feature logits [B, C_i] (matches PyTorch)."""
    w1s, b1s, w2s, b2s = packed
    B, F, D = x.shape
    Fw, Dw, H = w1s.shape
    Cp = w2s.shape[2]
    assert F == Fw and D == Dw

    # Pad batch to a sublane multiple (8) so all loads/stores are unmasked.
    Bp = max(8, _round_up(B, 8))
    xT = jnp.transpose(x, (1, 0, 2))                      # [F, B, D]
    if Bp != B:
        xT = jnp.pad(xT, ((0, 0), (0, Bp - B), (0, 0)))   # [F, Bp, D]

    out = pl.pallas_call(
        _sep_mlp_kernel,
        out_shape=jax.ShapeDtypeStruct((F, Bp, Cp), jnp.float32),
        grid=(F,),
        in_specs=[
            pl.BlockSpec((None, Bp, D), lambda f: (f, 0, 0)),   # x slab, feature f
            pl.BlockSpec((None, D, H), lambda f: (f, 0, 0)),    # W1_f
            pl.BlockSpec((None, 1, H), lambda f: (f, 0, 0)),    # b1_f
            pl.BlockSpec((None, H, Cp), lambda f: (f, 0, 0)),   # W2_f (padded)
            pl.BlockSpec((None, 1, Cp), lambda f: (f, 0, 0)),   # b2_f (padded)
        ],
        out_specs=pl.BlockSpec((None, Bp, Cp), lambda f: (f, 0, 0)),
        compiler_params=pltpu.CompilerParams(
            dimension_semantics=("parallel",)),               # free ~2x on v7x
    )(xT, w1s, b1s, w2s, b2s)                                  # [F, Bp, Cp]

    # Glue: slice the lane-dense slab back into the per-feature list API.
    return [out[i, :B, :c] for i, c in enumerate(categories)]


def sep_mlp_reference(x, params):
    """Pure-JAX reference for correctness check."""
    outs = []
    for i, (w1, b1, w2, b2) in enumerate(params):
        x_i = x[:, i, :]
        h = jnp.maximum(x_i @ w1 + b1, 0.0)
        outs.append(h @ w2 + b2)
    return outs


if __name__ == "__main__":
    # Small shapes consistent with sep_MLP's forward:
    #   batch=2, len_feats=3, dim=32 (hidden = 5*dim = 160), categories = [4, 6, 8]
    B, F, D = 2, 3, 32
    categories = [4, 6, 8]

    key = jax.random.PRNGKey(0)
    kx, kp = jax.random.split(key)
    x = jax.random.normal(kx, (B, F, D), jnp.float32)
    params = init_sep_mlp_params(kp, D, categories)
    packed = pack_sep_mlp_params(params)

    y_pred = sep_mlp_forward(x, packed, categories)
    y_pred = [jax.block_until_ready(y) for y in y_pred]

    # Sanity check against the pure-JAX reference.
    y_ref = sep_mlp_reference(x, params)
    for yi, ri, c in zip(y_pred, y_ref, categories):
        assert yi.shape == (B, c), (yi.shape, (B, c))
        assert jnp.allclose(yi, ri, atol=1e-5, rtol=1e-5)

    print("KERNEL_OK")
</pallas_src>

<mosaic_0001>
module attributes {stable_mosaic.version = 11 : i64} {
  func.func @_sep_mlp_kernel(%arg0: i32, %arg1: memref<1x8x32xf32, #tpu.memory_space<vmem>>, %arg2: memref<1x32x160xf32, #tpu.memory_space<vmem>>, %arg3: memref<1x1x160xf32, #tpu.memory_space<vmem>>, %arg4: memref<1x160x128xf32, #tpu.memory_space<vmem>>, %arg5: memref<1x1x128xf32, #tpu.memory_space<vmem>>, %arg6: memref<1x8x128xf32, #tpu.memory_space<vmem>>) attributes {dimension_semantics = [#tpu.dimension_semantics<parallel>], iteration_bounds = array<i64: 3>, scalar_prefetch = 0 : i64, scratch_operands = 0 : i64, tpu.core_type = #tpu.core_type<tc>, window_params = [{transform_indices = @transform_0, window_bounds = array<i64: 1, 8, 32>}, {transform_indices = @transform_1, window_bounds = array<i64: 1, 32, 160>}, {transform_indices = @transform_2, window_bounds = array<i64: 1, 1, 160>}, {transform_indices = @transform_3, window_bounds = array<i64: 1, 160, 128>}, {transform_indices = @transform_4, window_bounds = array<i64: 1, 1, 128>}, {transform_indices = @transform_5, window_bounds = array<i64: 1, 8, 128>}]} {
    %c0 = arith.constant 0 : index
    %c0_0 = arith.constant 0 : index
    %c0_1 = arith.constant 0 : index
    %0 = vector.load %arg1[%c0, %c0_0, %c0_1] : memref<1x8x32xf32, #tpu.memory_space<vmem>>, vector<1x8x32xf32>
    %1 = vector.shape_cast %0 : vector<1x8x32xf32> to vector<8x32xf32>
    %c0_2 = arith.constant 0 : index
    %c0_3 = arith.constant 0 : index
    %c0_4 = arith.constant 0 : index
    %2 = vector.load %arg2[%c0_2, %c0_3, %c0_4] : memref<1x32x160xf32, #tpu.memory_space<vmem>>, vector<1x32x160xf32>
    %3 = vector.shape_cast %2 : vector<1x32x160xf32> to vector<32x160xf32>
    %cst = arith.constant dense<0.000000e+00> : vector<8x160xf32>
    %4 = tpu.matmul %1, %3, %cst {dimension_numbers = #tpu.dot_dimension_numbers<[1], [0], [0], [1], [0, 0, 1, 1], [], []>} : vector<8x32xf32>, vector<32x160xf32>, vector<8x160xf32> -> vector<8x160xf32>
    %c0_5 = arith.constant 0 : index
    %c0_6 = arith.constant 0 : index
    %c0_7 = arith.constant 0 : index
    %5 = vector.load %arg3[%c0_5, %c0_6, %c0_7] : memref<1x1x160xf32, #tpu.memory_space<vmem>>, vector<1x1x160xf32>
    %6 = vector.shape_cast %5 : vector<1x1x160xf32> to vector<1x160xf32>
    %7 = vector.broadcast %6 : vector<1x160xf32> to vector<8x160xf32>
    %8 = arith.addf %4, %7 : vector<8x160xf32>
    %cst_8 = arith.constant 0.000000e+00 : f32
    %9 = vector.broadcast %cst_8 : f32 to vector<8x160xf32>
    %10 = arith.maximumf %8, %9 : vector<8x160xf32>
    %c0_9 = arith.constant 0 : index
    %c0_10 = arith.constant 0 : index
    %c0_11 = arith.constant 0 : index
    %11 = vector.load %arg4[%c0_9, %c0_10, %c0_11] : memref<1x160x128xf32, #tpu.memory_space<vmem>>, vector<1x160x128xf32>
    %12 = vector.shape_cast %11 : vector<1x160x128xf32> to vector<160x128xf32>
    %cst_12 = arith.constant dense<0.000000e+00> : vector<8x128xf32>
    %13 = tpu.matmul %10, %12, %cst_12 {dimension_numbers = #tpu.dot_dimension_numbers<[1], [0], [0], [1], [0, 0, 1, 1], [], []>} : vector<8x160xf32>, vector<160x128xf32>, vector<8x128xf32> -> vector<8x128xf32>
    %c0_13 = arith.constant 0 : index
    %c0_14 = arith.constant 0 : index
    %c0_15 = arith.constant 0 : index
    %14 = vector.load %arg5[%c0_13, %c0_14, %c0_15] : memref<1x1x128xf32, #tpu.memory_space<vmem>>, vector<1x1x128xf32>
    %15 = vector.shape_cast %14 : vector<1x1x128xf32> to vector<1x128xf32>
    %16 = vector.broadcast %15 : vector<1x128xf32> to vector<8x128xf32>
    %17 = arith.addf %13, %16 : vector<8x128xf32>
    %c0_16 = arith.constant 0 : index
    %c0_17 = arith.constant 0 : index
    %c0_18 = arith.constant 0 : index
    %18 = vector.load %arg6[%c0_16, %c0_17, %c0_18] : memref<1x8x128xf32, #tpu.memory_space<vmem>>, vector<1x8x128xf32>
    %19 = vector.shape_cast %18 : vector<1x8x128xf32> to vector<8x128xf32>
    %20 = vector.shape_cast %17 : vector<8x128xf32> to vector<1x8x128xf32>
    tpu.vector_store %arg6[%c0_16, %c0_17, %c0_18], %20 {strides = array<i32>} : memref<1x8x128xf32, #tpu.memory_space<vmem>>, vector<1x8x128xf32>,
    return
  }
  func.func @transform_0(%arg0: i32) -> (i32, i32, i32) {
    %c0_i32 = arith.constant 0 : i32
    %c0_i32_0 = arith.constant 0 : i32
    %c0_i32_1 = arith.constant 0 : i32
    return %arg0, %c0_i32, %c0_i32_0 : i32, i32, i32
  }
  func.func @transform_1(%arg0: i32) -> (i32, i32, i32) {
    %c0_i32 = arith.constant 0 : i32
    %c0_i32_0 = arith.constant 0 : i32
    %c0_i32_1 = arith.constant 0 : i32
    return %arg0, %c0_i32, %c0_i32_0 : i32, i32, i32
  }
  func.func @transform_2(%arg0: i32) -> (i32, i32, i32) {
    %c0_i32 = arith.constant 0 : i32
    %c0_i32_0 = arith.constant 0 : i32
    %c0_i32_1 = arith.constant 0 : i32
    return %arg0, %c0_i32, %c0_i32_0 : i32, i32, i32
  }
  func.func @transform_3(%arg0: i32) -> (i32, i32, i32) {
    %c0_i32 = arith.constant 0 : i32
    %c0_i32_0 = arith.constant 0 : i32
    %c0_i32_1 = arith.constant 0 : i32
    return %arg0, %c0_i32, %c0_i32_0 : i32, i32, i32
  }
  func.func @transform_4(%arg0: i32) -> (i32, i32, i32) {
    %c0_i32 = arith.constant 0 : i32
    %c0_i32_0 = arith.constant 0 : i32
    %c0_i32_1 = arith.constant 0 : i32
    return %arg0, %c0_i32, %c0_i32_0 : i32, i32, i32
  }
  func.func @transform_5(%arg0: i32) -> (i32, i32, i32) {
    %c0_i32 = arith.constant 0 : i32
    %c0_i32_0 = arith.constant 0 : i32
    %c0_i32_1 = arith.constant 0 : i32
    return %arg0, %c0_i32, %c0_i32_0 : i32, i32, i32
  }
}

</mosaic_0001>

<bundles_post_ra>
// kernel: tpu_custom_call.1
= control target key start
LH: loop header
LB: loop body
LE: loop exit
PB: predicated region body
PF: predicated region fallthrough
CT: control target
= control target key end

     0   :  { %s1308_s0 = inlined_call_operand.hbm [shape: f32[3,8,32], index: 0, kind: input, shape index: {}]   ;;  %s1309_s1 = inlined_call_operand.hbm [shape: f32[3,32,160], index: 1, kind: input, shape index: {}]   ;;  %s1310_s2 = inlined_call_operand.vmem [shape: f32[3,1,160], index: 2, kind: input, shape index: {}]   ;;  %s1311_s3 = inlined_call_operand.hbm [shape: f32[3,160,128], index: 3, kind: input, shape index: {}]   ;;  %s1312_s4 = inlined_call_operand.vmem [shape: f32[3,1,128], index: 4, kind: input, shape index: {}]   ;;  %s1313_s5 = inlined_call_operand.hbm [shape: f32[3,8,128], index: 5, kind: output, shape index: {}]  }
   0x1   :  { %1316 = sst [smem:[#allocation13_spill]] %s1309_s1 }
   0x2   :  { %10 = vsyncpa [#allocation3], 0 }
   0x3   :  { %12 = vsyncpa [#allocation3 + $0x1], 0 }
   0x4   :  { %13 = vsyncpa [#allocation6], 0 }
   0x5   :  { %15 = vsyncpa [#allocation6 + $0x1], 0 }
   0x6   :  { %16 = vsyncpa [#allocation4], 0 }
   0x7   :  { %18 = vsyncpa [#allocation4 + $0x1], 0  ;;  %s1022_s18 = smov 0   ;;  %s1024_s19 = smov 0  }
   0x8   :  { %s1026_s20 = smov 0   ;;  %s1028_s21 = smov 0  }
   0x9 LB: > { %s1043_s22 = sadd.s32 4294967295, %s980_s21   ;;  %s695_s23 = sadd.s32 4294967294, %s980_s21   ;;  %s980_s21 = sphi %s1028_s21, %s1334_s21   ;;  %s976_s20 = sphi %s1026_s20, %s1333_s20   ;;  %s972_s19 = sphi %s1024_s19, %s1332_s19   ;;  %s968_s18 = sphi %s1022_s18, %s1331_s18  }
   0xa   : > { %s1047_s24 = sadd.s32 1, %s980_s21   ;;  %s31_s25 = sadd.s32 1, %s976_s20 }
   0xb   : > { %s28_s26 = ssub.s32 %s980_s21, %s1047_s24  ;;  %p38_p0 = scmp.ne.s32.totalorder %s976_s20, %s972_s19 }
   0xc   : > { %p29_p1 = scmp.eq.s32.totalorder %s28_s26, 0  ;;  %p39_p2 = scmp.eq.s32.totalorder %s980_s21, 0 }
   0xd   : > { %p44_p3 = scmp.ne.s32.totalorder %s972_s19, %s968_s18  ;;  %p45_p4 = scmp.eq.s32.totalorder %s1043_s22, 0 }
   0xe   : > { %s1059_s27 = scalar_select %p29_p1, %s976_s20, %s31_s25  }
   0xf   : > { %p40_p5 = por %p39_p2, %p38_p0  ;;  %p1061_p6 = por %p45_p4, %p44_p3 }
  0x10   : > { %1317 = sst [smem:[#allocation12_spill]] %s1059_s27  ;;  %p172_p7 = scmp.eq.s32.totalorder %s1043_s22, 2 }
  0x11   : > { %s1318_s28 = scalar_select %p1061_p6, 1, 0 }
  0x12   : > { %p178_p8 = scmp.eq.s32.totalorder %s695_s23, 2  ;;  %p780_p9 = scmp.lt.s32.totalorder %s980_s21, 3 }
  0x13   : > { %p1067_p10 = por %p172_p7, %p38_p0  ;;  %s1076_s6 = sand.u32 1, %s976_s20  }
  0x14   : > { %p1071_p11 = por %p178_p8, %p44_p3  ;;  %p1078_p12 = pnand %p780_p9, %p40_p5 }
  0x15   : > { %s1319_s29 = scalar_select %p1067_p10, 1, 0 }
  0x16   : > { %s1320_s30 = scalar_select %p1071_p11, 1, 0 }
  0x17   : > { %s216_s8 = sand.u32 1, %s980_s21   ;;  %s700_s9 = sshll.u32 %s1076_s6, 6 }
  0x18   : > { %s716_s10 = sshll.u32 %s980_s21, 10  ;;  %s1322_s1 = sld [smem:[#allocation13_spill]] }
  0x19   : > { %s220_s14 = scalar_lea.vmem [#allocation5], %s700_s9  ;;  %s1093_s16 = scalar_lea.sflag [#allocation6], %s216_s8 }
  0x1a   : > { %s227_s15 = sshll.u32 %s220_s14, 4  ;;  %p1099_p1 = pneg %p1078_p12  ;;  %s1090_s15 = int_to_ptr.vmem [resolvable:$true] %s227_s15 }
  0x1e   : > { %s1088_s13 = scalar_lea.hbm %s1322_s1, %s716_s10  ;;  %s825_s9 = scalar_lea.hbm %s1322_s1, 3072 }
  0x1f   : > { %s820_s17 = scalar_lea.hbm %s1088_s13, 1024  ;;  %p826_p4 = scmp.lt.u32.totalorder %s1088_s13, %s1322_s1 }
  0x20   : > { %p821_p0 = scmp.ne.s32.totalorder %s1088_s13, %s820_s17  ;;  %p827_p5 = scmp.lt.u32.totalorder %s825_s9, %s820_s17 }
  0x21   : > { %p829_p8 = scmp.lt.u32.totalorder %s820_s17, %s1088_s13 }
  0x22   : > { %p823_p2 = pnand %p1099_p1, %p821_p0  ;;  %p828_p7 = por %p827_p5, %p826_p4 }
  0x24   : > { %p824_p3 = pneg %p823_p2  ;;  %p830_p9 = por %p829_p8, %p828_p7 }
  0x26   : > { %p831_p13 = pnand %p830_p9, %p824_p3 }
  0x28   : > { %834 = shalt.err (!%p831_p13)
}
  0x29   : > { %s835_s8 = scalar_lea.vmem %s1090_s15, 1024  ;;  %s982_s12 = smov [#allocation5]  }
  0x2a   : > { %p836_p0 = scmp.ne.s32.totalorder %s1090_s15, %s835_s8  ;;  %s840_s14 = sshll.u32 %s982_s12, 4  ;;  %s841_s14 = int_to_ptr.vmem [resolvable:$false] %s840_s14 }
  0x2b   : > { %s842_s25 = scalar_lea.vmem %s841_s14, 2048  ;;  %p843_p10 = scmp.lt.s32.totalorder %s1090_s15, %s841_s14 }
  0x2c   : > { %p838_p2 = pnand %p836_p0, %p1099_p1  ;;  %p844_p6 = scmp.lt.s32.totalorder %s842_s25, %s835_s8 }
  0x2e   : > { %p839_p11 = pneg %p838_p2  ;;  %p845_p4 = por %p844_p6, %p843_p10 }
  0x30   : > { %p846_p5 = pnand %p845_p4, %p839_p11 }
  0x32   : > { %849 = shalt.err (!%p846_p5)
}
  0x33   : > { %s983_s17 = smov 256   ;;  %s984_s26 = smov 16  }
  0x34   : > { %772 = dma.hbm_to_vmem [thread:$0]  (!%p1078_p12), %s1088_s13, 1024, %s1090_s15, %s1093_s16, %s983_s17, %s983_s17, %s984_s26  }
  0x35   : > { %p269_p13 = scmp.lt.s32.totalorder %s980_s21, 4  ;;  %s698_s9 = sshll.u32 %s1076_s6, 3 }
  0x36   : > { %s699_s10 = sshll.u32 %s980_s21, 7  ;;  %p1324_p6 = scmp.ge.s32.totalorder %s980_s21, 1 }
  0x37   : > { %s1135_s14 = scalar_lea.hbm %s1308_s0, %s699_s10  ;;  %s202_s25 = scalar_lea.vmem [#allocation2], %s698_s9 }
  0x38   : > { %p1128_p10 = pnand %p1324_p6, %p269_p13  ;;  %s209_s1 = sshll.u32 %s202_s25, 4  ;;  %s1137_s1 = int_to_ptr.vmem [resolvable:$true] %s209_s1 }
  0x39   : > { %s755_s13 = smul.u32 160, %s1076_s6  ;;  %s199_s15 = scalar_lea.sflag [#allocation3], %s1076_s6 }
  0x3a   : > { %s1325_s11 = scalar_select %p1128_p10, 1, 0 }
  0x3b   : > { %s850_s17 = scalar_lea.hbm %s1135_s14, 128  ;;  %s855_s10 = scalar_lea.hbm %s1308_s0, 384 }
  0x3c   : > { %p851_p11 = scmp.ne.s32.totalorder %s1135_s14, %s850_s17  ;;  %p856_p8 = scmp.lt.u32.totalorder %s1135_s14, %s1308_s0 }
  0x3d   : > { %p857_p9 = scmp.lt.u32.totalorder %s855_s10, %s850_s17  ;;  %p859_p2 = scmp.lt.u32.totalorder %s850_s17, %s1135_s14 }
  0x3e   : > { %p853_p3 = pnand %p851_p11, %p1099_p1 }
  0x3f   : > { %p858_p0 = por %p857_p9, %p856_p8 }
  0x40   : > { %p854_p7 = pneg %p853_p3 }
  0x41   : > { %p860_p4 = por %p859_p2, %p858_p0 }
  0x43   : > { %p861_p5 = pnand %p860_p4, %p854_p7 }
  0x45   : > { %864 = shalt.err (!%p861_p5)
}
  0x46   : > { %s865_s9 = scalar_lea.vmem %s1137_s1, 128  ;;  %s985_s27 = smov [#allocation2]  }
  0x47   : > { %p866_p13 = scmp.ne.s32.totalorder %s1137_s1, %s865_s9  ;;  %s870_s25 = sshll.u32 %s985_s27, 4  ;;  %s871_s25 = int_to_ptr.vmem [resolvable:$false] %s870_s25 }
  0x48   : > { %s872_s26 = scalar_lea.vmem %s871_s25, 256  ;;  %p873_p3 = scmp.lt.s32.totalorder %s1137_s1, %s871_s25 }
  0x49   : > { %p868_p6 = pnand %p866_p13, %p1099_p1  ;;  %p874_p10 = scmp.lt.s32.totalorder %s872_s26, %s865_s9 }
  0x4b   : > { %p869_p11 = pneg %p868_p6  ;;  %p875_p8 = por %p874_p10, %p873_p3 }
  0x4d   : > { %p876_p9 = pnand %p875_p8, %p869_p11 }
  0x4f   : > { %879 = shalt.err (!%p876_p9)
}
  0x50   : > { %769 = dma.hbm_to_vmem [thread:$0]  (!%p1078_p12), %s1135_s14, 128, %s1137_s1, %s199_s15  }
  0x51   : > { %s756_s17 = smul.u32 2560, %s980_s21  ;;  %s248_s10 = scalar_lea.vmem [#allocation7], %s755_s13 }
  0x52   : > { %s255_s8 = sshll.u32 %s248_s10, 4  ;;  %s885_s14 = scalar_lea.hbm %s1311_s3, 7680  ;;  %s1170_s8 = int_to_ptr.vmem [resolvable:$true] %s255_s8 }
  0x53   : > { %s1168_s25 = scalar_lea.hbm %s1311_s3, %s756_s17 }
  0x54   : > { %s880_s9 = scalar_lea.hbm %s1168_s25, 2560  ;;  %p886_p2 = scmp.lt.u32.totalorder %s1168_s25, %s1311_s3 }
  0x55   : > { %p881_p10 = scmp.ne.s32.totalorder %s1168_s25, %s880_s9  ;;  %p887_p4 = scmp.lt.u32.totalorder %s885_s14, %s880_s9 }
  0x56   : > { %p889_p13 = scmp.lt.u32.totalorder %s880_s9, %s1168_s25 }
  0x57   : > { %p883_p7 = pnand %p881_p10, %p1099_p1  ;;  %p888_p5 = por %p887_p4, %p886_p2 }
  0x59   : > { %p884_p0 = pneg %p883_p7  ;;  %p890_p6 = por %p889_p13, %p888_p5 }
  0x5b   : > { %p891_p11 = pnand %p890_p6, %p884_p0 }
  0x5d   : > { %894 = shalt.err (!%p891_p11)
}
  0x5e   : > { %s895_s26 = scalar_lea.vmem %s1170_s8, 2560  ;;  %s986_s17 = smov [#allocation7]  }
  0x5f   : > { %p896_p3 = scmp.ne.s32.totalorder %s1170_s8, %s895_s26  ;;  %s900_s10 = sshll.u32 %s986_s17, 4  ;;  %s901_s10 = int_to_ptr.vmem [resolvable:$false] %s900_s10 }
  0x60   : > { %s902_s12 = scalar_lea.vmem %s901_s10, 5120  ;;  %p903_p10 = scmp.lt.s32.totalorder %s1170_s8, %s901_s10 }
  0x61   : > { %p898_p8 = pnand %p896_p3, %p1099_p1  ;;  %p904_p7 = scmp.lt.s32.totalorder %s902_s12, %s895_s26 }
  0x63   : > { %p899_p9 = pneg %p898_p8  ;;  %p905_p2 = por %p904_p7, %p903_p10 }
  0x65   : > { %p906_p4 = pnand %p905_p2, %p899_p9 }
  0x67   : > { %909 = shalt.err (!%p906_p4)
}
  0x68   : > { %s987_s27 = smov 128   ;;  %s988_s9 = smov 8  }
  0x69   : > { %775 = dma.hbm_to_vmem [thread:$0]  (!%p1078_p12), %s1168_s25, 2560, %s1170_s8, %s1093_s16, %s987_s27, %s987_s27, %s988_s9  }
  0x6a   : > { %p1326_p1 = scmp.ne.s32.totalorder %s1325_s11, 0 }
  0x6b   : > { %s1197_s23 = sand.u32 (!%p1326_p1), 1, %s972_s19   ;;  %p1327_p0 = scmp.ne.s32.totalorder (!%p1326_p1), %s1318_s28, 0 }
  0x6c   : > { %273 = sbr.rel (%p1326_p1) target bundleno = 576 (0x240), region = 40  ;;  %s705_s1 = sshll.u32 (!%p1326_p1), %s1197_s23, 3 }
  0x6d   : > { %s276_s6 = scalar_lea.sflag (!%p1326_p1), [#allocation3], %s1197_s23  ;;  %s1203_s14 = scalar_lea.vmem (!%p1326_p1), [#allocation2], %s705_s1 }
  0x73   : > { %955 = dma.done.wait (%p1327_p0), %s276_s6, 128  }
  0x74   : > { %957 = vsyncadd (%p1327_p0), %s276_s6, 4294967168  ;;  %s284_s7 = sand.u32 1, %s1043_s22   ;;  %s706_s16 = sshll.u32 %s1197_s23, 6 }
  0x75   : > { %s285_s11 = scalar_lea.sflag [#allocation6], %s284_s7  ;;  %s288_s8 = scalar_lea.vmem [#allocation5], %s706_s16 }
  0x76   : > { %959 = dma.done.wait (%p1327_p0), %s285_s11, 3584  }
  0x77   : > { %961 = vsyncadd (%p1327_p0), %s285_s11, 4294963712  ;;  %v989_v0 = vmov 0.0   ;;  %v990_v1 = vmov 0.0|0.0   ;;  %s757_s25 = smul.u32 160, %s1197_s23  ;;  %v350_v2 = vld [vmem:[%s288_s8 + $0x8] sm:$0xff]  ;;  %v352_v3 = vld [vmem:[%s288_s8 + $0x18] sm:$0xff]  ;;  %v359_v45 = vlaneseq }
  0x78   : > { %437 = vmatprep.mubr.f32.mxu0 %v989_v0  ;;  %725 = vmatprep.subr.bf16.mxu1 %v990_v1  ;;  %v349_v4 = vld [vmem:[%s288_s8] sm:$0xff]  ;;  %v717_v5 = vpack.c.bf16 %v352_v3, %v350_v2  ;;  %v351_v6 = vld [vmem:[%s288_s8 + $0x10] sm:$0xff]  ;;  %v354_v7 = vld [vmem:[%s288_s8 + $0x28] sm:$0xff]  ;;  %vm369_vm0 = vcmask 261120   ;;  %p341_p12 = scmp.lt.s32.totalorder %s1043_s22, 2  ;;  %s713_s6 = sshll.u32 %s1043_s22, 7 }
  0x79   : > { %v356_v8 = vld [vmem:[%s288_s8 + $0x38] sm:$0xff]  ;;  %v719_v9 = vpack.c.bf16 %v351_v6, %v349_v4  ;;  %v353_v11 = vld [vmem:[%s288_s8 + $0x20] sm:$0xff]  ;;  %v355_v12 = vld [vmem:[%s288_s8 + $0x30] sm:$0xff]  ;;  %s1217_s28 = scalar_lea.vmem [#allocation7], %s757_s25  ;;  %v360_v46 = vshrl.u32 %v359_v45, 7  ;;  %s1265_s8 = scalar_lea.hbm %s1313_s5, %s713_s6 }
  0x7a   : > { %v721_v10 = vpack.c.bf16 %v356_v8, %v354_v7  ;;  %718 = vmatprep.subr.bf16.mxu0 %v717_v5  ;;  %v446_v13 = vld [vmem:[%s1217_s28] sm:$0xff]  ;;  %v447_v14 = vld [vmem:[%s1217_s28 + $0x8] sm:$0xff]  ;;  %v448_v15 = vld [vmem:[%s1217_s28 + $0x10] sm:$0xff]  ;;  %v723_v16 = vpack.c.bf16 %v355_v12, %v353_v11  ;;  %s342_s13 = scalar_select %p341_p12, %s1043_s22, 2 }
  0x7b   : > { %720 = vmatpush1.bf16.msra.mxu0 %v719_v9  ;;  %v726_v17 = vpack.c.bf16 %v447_v14, %v446_v13  ;;  %v449_v18 = vld [vmem:[%s1217_s28 + $0x18] sm:$0xff]  ;;  %v450_v20 = vld [vmem:[%s1217_s28 + $0x20] sm:$0xff]  ;;  %v451_v21 = vld [vmem:[%s1217_s28 + $0x28] sm:$0xff]  ;;  %v361_v47 = vsub.s32 0, %v360_v46  ;;  %v365_v49 = vsub.s32 1, %v360_v46  ;;  %s548_s25 = scalar_lea.sflag [#allocation4], %s1197_s23 }
  0x7c   : > { %722 = vmatprep.subr.bf16.mxu0 %v721_v10  ;;  %v729_v19 = vpack.c.bf16 %v449_v18, %v448_v15  ;;  %v348_v22 = vld [vmem:[%s1203_s14] sm:$0xff]  ;;  %v732_v23 = vpack.c.bf16 %v451_v21, %v450_v20  ;;  %v454_v27 = vld [vmem:[%s1217_s28 + $0x40] sm:$0xff]  ;;  %v455_v28 = vld [vmem:[%s1217_s28 + $0x48] sm:$0xff]  ;;  %s708_s15 = sshll.u32 %s342_s13, 1  ;;  %s347_s9 = scalar_lea.vmem %s1312_s4, %s342_s13 }
  0x7d   : > { %727 = vmatpush1.bf16.msra.mxu1 %v726_v17  ;;  %v452_v24 = vld [vmem:[%s1217_s28 + $0x30] sm:$0xff]  ;;  %v453_v25 = vld [vmem:[%s1217_s28 + $0x38] sm:$0xff]  ;;  %v738_v29 = vpack.c.bf16 %v455_v28, %v454_v27  ;;  %v458_v33 = vld [vmem:[%s1217_s28 + $0x60] sm:$0xff]  ;;  %s344_s10 = scalar_lea.vmem %s1310_s2, %s708_s15  ;;  %s340_s14 = scalar_lea.vmem [#allocation8], %s705_s1 }
  0x7e   : > { %728 = vmatprep.subr.bf16.mxu1 %v990_v1  ;;  %v735_v26 = vpack.c.bf16 %v453_v25, %v452_v24  ;;  %v456_v30 = vld [vmem:[%s1217_s28 + $0x50] sm:$0xff]  ;;  %v457_v31 = vld [vmem:[%s1217_s28 + $0x58] sm:$0xff]  ;;  %v459_v34 = vld [vmem:[%s1217_s28 + $0x68] sm:$0xff]  ;;  %s561_s7 = sshll.u32 %s340_s14, 4  ;;  %p1328_p13 = scmp.ne.s32.totalorder %s1319_s29, 0  ;;  %s1267_s7 = int_to_ptr.vmem [resolvable:$true] %s561_s7 }
  0x7f   : > { %724 = vmatpush1.bf16.msra.mxu0 %v723_v16  ;;  %v741_v32 = vpack.c.bf16 %v457_v31, %v456_v30  ;;  %v744_v35 = vpack.c.bf16 %v459_v34, %v458_v33  ;;  %v460_v36 = vld [vmem:[%s1217_s28 + $0x70] sm:$0xff]  ;;  %v461_v37 = vld [vmem:[%s1217_s28 + $0x78] sm:$0xff]  ;;  %v462_v39 = vld [vmem:[%s1217_s28 + $0x80] sm:$0xff]  ;;  %s991_s22 = smov [#allocation8]  }
  0x80   : > { %v747_v38 = vpack.c.bf16 %v461_v37, %v460_v36  ;;  %v463_v40 = vld [vmem:[%s1217_s28 + $0x88] sm:$0xff]  ;;  %v464_v42 = vld [vmem:[%s1217_s28 + $0x90] sm:$0xff]  ;;  %v465_v43 = vld [vmem:[%s1217_s28 + $0x98] sm:$0xff]  ;;  %s910_s28 = scalar_lea.vmem %s1267_s7, 128  ;;  %s914_s1 = sshll.u32 %s991_s22, 4  ;;  %s915_s1 = int_to_ptr.vmem [resolvable:$false] %s914_s1 }
  0x81   : > { %730 = vmatpush1.bf16.msra.mxu1 %v729_v19  ;;  %v750_v41 = vpack.c.bf16 %v463_v40, %v462_v39  ;;  %v753_v44 = vpack.c.bf16 %v465_v43, %v464_v42  ;;  %v357_v48 = vld [vmem:[%s344_s10] sm:$0x3]  ;;  %p911_p5 = scmp.ne.s32.totalorder %s1267_s7, %s910_s28  ;;  %s916_s13 = scalar_lea.vmem %s915_s1, 256 }
  0x82   : > { %709 = vmatmul.mubr.msk.f32.vlgmr.msra.gmra.mrb[0].mxu0 %vm369_vm0, %v348_v22  ;;  %731 = vmatprep.subr.bf16.mxu1 %v990_v1  ;;  %v362_v50 = vrot.slane %v357_v48, %v361_v47  ;;  %v366_v51 = vrot.slane %v357_v48, %v365_v49  ;;  %v710_v58 = vld [vmem:[%s347_s9] ss:$0 sm:$0xff]  ;;  %p917_p3 = scmp.lt.s32.totalorder %s1267_s7, %s915_s1  ;;  %p918_p8 = scmp.lt.s32.totalorder %s916_s13, %s910_s28 }
  0x83   : > { %p912_p6 = pnand %p911_p5, %p1328_p13 }
  0x84   : > { %p919_p9 = por %p918_p8, %p917_p3 }
  0x85   : > { %733 = vmatpush1.bf16.msra.mxu1 %v732_v23  ;;  %p913_p11 = pneg %p912_p6 }
  0x86   : > { %734 = vmatprep.subr.bf16.mxu1 %v990_v1 }
  0x87   : > { %p920_p10 = pnand %p919_p9, %p913_p11 }
  0x89   : > { %736 = vmatpush1.bf16.msra.mxu1 %v735_v26 }
  0x8a   : > { %737 = vmatprep.subr.bf16.mxu1 %v990_v1 }
  0x8d   : > { %739 = vmatpush1.bf16.msra.mxu1 %v738_v29 }
  0x8e   : > { %740 = vmatprep.subr.bf16.mxu1 %v990_v1 }
  0x91   : > { %742 = vmatpush1.bf16.msra.mxu1 %v741_v32 }
  0x92   : > { %743 = vmatprep.subr.bf16.mxu1 %v990_v1 }
  0x95   : > { %745 = vmatpush1.bf16.msra.mxu1 %v744_v35 }
  0x96   : > { %746 = vmatprep.subr.bf16.mxu1 %v990_v1 }
  0x99   : > { %748 = vmatpush1.bf16.msra.mxu1 %v747_v38 }
  0x9a   : > { %749 = vmatprep.subr.bf16.mxu1 %v990_v1 }
  0x9d   : > { %751 = vmatpush1.bf16.msra.mxu1 %v750_v41 }
  0x9e   : > { %752 = vmatprep.subr.bf16.mxu1 %v990_v1 }
  0xa1   : > { %754 = vmatpush1.bf16.msra.mxu1 %v753_v44 }
 0x155   : > { %v439_v52 = vpop.f32.mrb[0].mxu0 }
 0x156   : > { %v440_v53 = vadd.f32 %v439_v52, %v362_v50  ;;  %v441_v54 = vpop.f32.mrb[1].mxu0 }
 0x157   : > { %v442_v55 = vadd.f32 %v441_v54, %v366_v51 }
 0x158   : > { %v444_v57 = vmax.f32 %v440_v53, 0.0 }
 0x159   : > { %v445_v56 = vmax.f32 %v442_v55, 0.0 }
 0x15b   : > { %711 = vmatprep.mubr.msk.f32.mxu1 %vm369_vm0, %v445_v56 }
 0x15c   : > { %541 = vmatmul.mubr.f32.vlgmr.msra.gmra.mrb[0].mxu1 %v444_v57 }
 0x22f   : > { %v542_v59 = vpop.f32.mrb[0].mxu1 }
 0x230   : > { %v543_v60 = vadd.f32 %v710_v58, %v542_v59  ;;  %v544_v61 = vpop.f32.mrb[1].mxu1 }
 0x232   : > { %546 = vst [vmem:[%s340_s14] sm:$0xff] %v543_v60 }
 0x233   : > { %923 = shalt.err (!%p920_p10)
}
 0x234   : > { %s924_s23 = scalar_lea.hbm %s1265_s8, 128  ;;  %s928_s17 = scalar_lea.hbm %s1313_s5, 384 }
 0x235   : > { %p925_p7 = scmp.ne.s32.totalorder %s1265_s8, %s924_s23  ;;  %p929_p1 = scmp.lt.u32.totalorder %s1265_s8, %s1313_s5 }
 0x236   : > { %p930_p0 = scmp.lt.u32.totalorder %s928_s17, %s924_s23  ;;  %p932_p5 = scmp.lt.u32.totalorder %s924_s23, %s1265_s8 }
 0x237   : > { %p926_p2 = pnand %p925_p7, %p1328_p13 }
 0x238   : > { %p931_p12 = por %p930_p0, %p929_p1 }
 0x239   : > { %p927_p4 = pneg %p926_p2 }
 0x23a   : > { %p933_p6 = por %p932_p5, %p931_p12 }
 0x23c   : > { %p934_p11 = pnand %p933_p6, %p927_p4 }
 0x23e   : > { %937 = shalt.err (!%p934_p11)
}
 0x23f   : > { %764 = dma.vmem_to_hbm [thread:$0]  (%p1328_p13), %s1267_s7, 128, %s1265_s8, %s548_s25  }
 0x240 PF: > { %p781_p3 = scmp.ge.s32.totalorder %s980_s21, 2  ;;  %s573_s27 = sand.u32 1, %s968_s18  }
 0x241   : > { %p1329_p8 = scmp.ne.s32.totalorder %s1320_s30, 0  ;;  %s574_s9 = scalar_lea.sflag [#allocation4], %s573_s27 }
 0x243   : > { %p777_p9 = pnand %p781_p3, %p1329_p8 }
 0x245   : > { %963 = dma.done.wait (!%p777_p9), %s574_s9, 128  }
 0x246   : > { %965 = vsyncadd (!%p777_p9), %s574_s9, 4294967168  ;;  %s1330_s6 = sld [smem:[#allocation12_spill]]  ;;  %p21_p10 = scmp.ge.s32.totalorder %s1047_s24, 5  }
 0x247   : > { %s1331_s18 = smov %s972_s19  ;;  %s1332_s19 = smov %s976_s20 }
 0x248   : > { %s1334_s21 = smov %s1047_s24  ;;  %23 = sbr.rel (!%p21_p10) target bundleno = 9 (0x9), region = 115 }
 0x24c   : > { %s1333_s20 = smov %s1330_s6 }
 0x24f   :  { %579 = vsyncpa [#allocation3], 1 }
 0x250   :  { %581 = vsyncpa [#allocation3 + $0x1], 1 }
 0x251   :  { %582 = vsyncpa [#allocation6], 1 }
 0x252   :  { %584 = vsyncpa [#allocation6 + $0x1], 1 }
 0x253   :  { %585 = vsyncpa [#allocation4], 1 }
 0x254   :  { %587 = vsyncpa [#allocation4 + $0x1], 1 }

</bundles_post_ra>
